<compile_context>
chip_gen: v7x
topology: tpu7x:2x2x1
jax: 0.10.0
libtpu: 0.0.40
codegen_flags: <defaults>
</compile_context>

<pallas_src>
import functools

import jax
import jax.numpy as jnp
from jax import lax
from jax.experimental import pallas as pl
from jax.experimental.pallas import tpu as pltpu


def _round_up(x, m):
    return ((x + m - 1) // m) * m


def _pick_fold(H, W):
    """Fold k image rows into the lane dim so the folded width is lane-dense."""
    if W % 128 == 0:
        return 1
    # Prefer the smallest fold whose folded width is an exact multiple of 128
    # (no lane padding; keeps Hf large for H-tiling).
    for f in range(1, H + 1):
        if H % f == 0 and (f * W) % 128 == 0 and f * W <= 512:
            return f
    # Otherwise fold up towards 128 lanes and pad the remainder.
    best = 1
    f = 2
    while f * W <= 128 and f <= H:
        if H % f == 0:
            best = f
        f += 1
    return best


def _pick_tile_rows(Hf, Wf, bytes_per_row, target_elems, vmem_budget):
    """Multiple-of-8 folded-row tile height.

    Capped by (a) a working-set target so the ~12 live f32 temporaries do not
    spill excessively, (b) a VMEM byte budget, (c) the padded image height.
    Prefers the largest tile whose Hf-padding overhead stays below ~12.5%.
    """
    hf8 = _round_up(Hf, 8)
    cap = min(_round_up(max(target_elems // Wf, 8), 8),
              max((vmem_budget // max(bytes_per_row, 1)) // 8 * 8, 8),
              hf8)
    cap = max(cap, 8)
    best = 8
    for thf in range(8, cap + 1, 8):
        pad = _round_up(Hf, thf) - Hf
        if pad == 0 or pad * 8 <= Hf:
            best = thf
    return best


def _vmem_capacity_bytes():
    try:
        cap = int(pltpu.get_tpu_info().vmem_capacity_bytes)
    except Exception:
        cap = 64 << 20            # conservative (v7x-sized) default
    return max(cap, 48 << 20)


def _boundary_loss_kernel(pred_ref, target_ref, out_ref, acc_ref, halo_ref, *,
                          theta, num_classes, w_orig, fold, w_valid,
                          hf_valid, hf_padded):
    t = pl.program_id(1)
    n_t = pl.num_programs(1)
    thf, wf = target_ref.shape

    tgt = target_ref[...]                                    # (THf, Wf) int32

    # ---- per-pixel softmax cross-entropy, streaming one channel at a time ----
    # Two passes (running max, then sum-exp + selected logit): EUP stays at
    # C exps + 1 log per pixel; the extra per-channel VMEM loads ride the
    # load slots, which have slack.
    m = pred_ref[0].astype(jnp.float32)
    for c in range(1, num_classes):
        m = jnp.maximum(m, pred_ref[c].astype(jnp.float32))
    s = jnp.zeros_like(m)
    sel = jnp.zeros_like(m)
    for c in range(num_classes):
        x = pred_ref[c].astype(jnp.float32)
        s = s + jnp.exp(x - m)
        sel = jnp.where(tgt == c, x, sel)
    # NOTE: labels outside [0, num_classes) give sel == 0 (ce == logsumexp);
    # the reference module assumes valid labels, so we do too.
    ce = m + jnp.log(s) - sel                                # (THf, Wf)

    # ---- boundary map of the foreground (class 1) mask, folded layout ----
    fg = (tgt == 1).astype(jnp.float32)
    lane = lax.broadcasted_iota(jnp.int32, (1, wf), 1)       # (1, Wf)
    row = lax.broadcasted_iota(jnp.int32, (thf, 1), 0)       # (THf, 1)

    # Horizontal gradient: |fg[h, w] - fg[h, w-1]|, zero at w == 0 of every
    # original image row (= the first lane of every folded chunk).
    left = pltpu.roll(fg, shift=1, axis=1)
    if (w_orig & (w_orig - 1)) == 0:                         # W is a power of two
        first_col = (lane & (w_orig - 1)) == 0
    else:
        first_col = lane == 0
        for j in range(1, fold):
            first_col = jnp.logical_or(first_col, lane == j * w_orig)
    grad_x = jnp.where(first_col, 0.0, jnp.abs(fg - left))

    # Vertical gradient: |fg[h, w] - fg[h-1, w]| (zero at the global first row).
    #   prev_chunk[p]   : previous original row for lanes in chunks j >= 1
    #                     (same folded row, previous chunk).
    #   last_chunk[p<W] : last chunk of the same folded row; shifted down one
    #                     folded row (XLU sublane roll) + halo it becomes the
    #                     previous original row for chunk-0 lanes.
    prev_chunk = pltpu.roll(fg, shift=w_orig, axis=1) if fold > 1 else None
    s_roll = (wf - (fold - 1) * w_orig) % wf
    if s_roll == 0:
        last_chunk = fg
    elif prev_chunk is not None and s_roll == w_orig:
        last_chunk = prev_chunk
    else:
        last_chunk = pltpu.roll(fg, shift=s_roll, axis=1)

    @pl.when(t == 0)
    def _init_halo():
        # Global first original row: the reference zero-pads the forward
        # difference, which equals using the row itself as its own prev row.
        halo_ref[...] = fg[0:1, :]

    halo_prev = halo_ref[...]                                # (1, Wf)
    halo_ref[...] = last_chunk[thf - 1:thf, :]               # carry to next tile

    prev_within = pltpu.roll(last_chunk, shift=1, axis=0)    # XLU sublane roll
    prev_row_across = jnp.where(row == 0, halo_prev, prev_within)
    if fold == 1:
        fg_up = prev_row_across
    else:
        fg_up = jnp.where(lane < w_orig, prev_row_across, prev_chunk)
    grad_y = jnp.abs(fg - fg_up)

    weight = 1.0 + theta * jnp.maximum(grad_y, grad_x)
    contrib = weight * ce

    # Zero lane / row padding (emitted only when padding exists — static).
    valid = None
    if w_valid < wf:
        valid = lane < w_valid
    if hf_valid < hf_padded:
        row_ok = (t * thf + row) < hf_valid
        valid = row_ok if valid is None else jnp.logical_and(valid, row_ok)
    if valid is not None:
        contrib = jnp.where(valid, contrib, 0.0)

    # ---- small (8, Wf) accumulator: sublane-aligned VPU adds per tile ----
    part = contrib[0:8, :]
    for r in range(1, thf // 8):
        part = part + contrib[r * 8:(r + 1) * 8, :]

    @pl.when(t == 0)
    def _init_acc():
        acc_ref[...] = jnp.zeros_like(acc_ref)

    acc_ref[...] += part

    @pl.when(t == n_t - 1)
    def _finalize():
        total = jnp.sum(acc_ref[...])        # one cross-lane reduce per batch
        out_ref[...] = jnp.broadcast_to(total, out_ref.shape).astype(out_ref.dtype)


def boundary_loss(pred, target, theta=1.0, *, max_tile_rows=None):
    """pred: [B, C, H, W] float logits; target: [B, H, W] integer labels."""
    B, C, H, W = pred.shape
    assert target.shape == (B, H, W)

    # Lane-dense folded layout (free row-major reshape + pad in the wrapper).
    fold = _pick_fold(H, W)
    Hf = H // fold
    w_valid = fold * W
    Wf = _round_up(w_valid, 128)

    pred_isz = jnp.dtype(pred.dtype).itemsize
    vmem_cap = _vmem_capacity_bytes()
    # Bytes charged per folded row of a tile: double-buffered input blocks plus
    # ~12 live f32 temporaries created by the kernel body.
    bytes_per_row = Wf * (2 * (C * pred_isz + 4) + 12 * 4)
    thf = _pick_tile_rows(
        Hf, Wf, bytes_per_row,
        target_elems=32 * 1024,
        vmem_budget=min(max(vmem_cap // 4, 16 << 20), 48 << 20))
    if max_tile_rows is not None:
        thf = max(8, min(thf, _round_up(max_tile_rows, 8)))
    Hf_pad = _round_up(Hf, thf)

    pred_f = pred.reshape(B, C, Hf, w_valid)
    target_f = target.astype(jnp.int32).reshape(B, Hf, w_valid)
    pad_h, pad_w = Hf_pad - Hf, Wf - w_valid
    if pad_h or pad_w:
        pred_f = jnp.pad(pred_f, ((0, 0), (0, 0), (0, pad_h), (0, pad_w)))
        target_f = jnp.pad(target_f, ((0, 0), (0, pad_h), (0, pad_w)))

    grid = (B, Hf_pad // thf)

    kernel = functools.partial(
        _boundary_loss_kernel, theta=float(theta), num_classes=C, w_orig=W,
        fold=fold, w_valid=w_valid, hf_valid=Hf, hf_padded=Hf_pad)

    # Scoped-VMEM limit: double-buffered inputs/outputs + scratch + an estimate
    # of the kernel's live temporaries, capped below the chip's VMEM capacity.
    tile_bytes = (2 * thf * Wf * (C * pred_isz + 4)   # pred + target tiles, x2 buffers
                  + 2 * 8 * 128 * 4                   # output block, x2 buffers
                  + (8 + 1) * Wf * 4                  # acc + halo scratch
                  + 12 * thf * Wf * 4)                # live f32 temporaries
    vmem_limit = min(max(tile_bytes + (8 << 20), 32 << 20), vmem_cap - (16 << 20))

    out = pl.pallas_call(
        kernel,
        out_shape=jax.ShapeDtypeStruct((B, 8, 128), jnp.float32),
        grid_spec=pltpu.PrefetchScalarGridSpec(
            num_scalar_prefetch=0,
            grid=grid,
            in_specs=[
                pl.BlockSpec((pl.Squeezed(), C, thf, Wf),
                             lambda b, t: (b, 0, t, 0)),
                pl.BlockSpec((pl.Squeezed(), thf, Wf),
                             lambda b, t: (b, t, 0)),
            ],
            out_specs=pl.BlockSpec((1, 8, 128), lambda b, t: (b, 0, 0)),
            scratch_shapes=[
                pltpu.VMEM((8, Wf), jnp.float32),     # per-batch weighted-CE accumulator
                pltpu.VMEM((1, Wf), jnp.float32),     # halo: last fg row of previous tile
            ],
        ),
        compiler_params=pltpu.CompilerParams(
            dimension_semantics=("parallel", "arbitrary"),
            vmem_limit_bytes=int(vmem_limit),
        ),
    )(pred_f, target_f)

    per_batch = out[:, 0, 0]
    return jnp.sum(per_batch) / (B * H * W)


def _reference_loss(pred, target, theta=1.0):
    """Pure-JAX mirror of the PyTorch module, for correctness checking."""
    C = pred.shape[1]
    one_hot = jnp.moveaxis(jax.nn.one_hot(target, C, dtype=jnp.float32), -1, 1)
    fg = one_hot[:, 1, :, :]
    gy = jnp.abs(fg[:, 1:, :] - fg[:, :-1, :])
    gx = jnp.abs(fg[:, :, 1:] - fg[:, :, :-1])
    gy = jnp.pad(gy, ((0, 0), (1, 0), (0, 0)))
    gx = jnp.pad(gx, ((0, 0), (0, 0), (1, 0)))
    boundaries = jnp.maximum(gy, gx)
    logp = jax.nn.log_softmax(pred, axis=1)
    ce = -jnp.take_along_axis(logp, target[:, None, :, :], axis=1)[:, 0]
    return jnp.mean((1.0 + theta * boundaries) * ce)


if __name__ == "__main__":
    key = jax.random.PRNGKey(0)
    k1, k2, k3, k4 = jax.random.split(key, 4)

    # Case 1: B=2, C=4, 16x16 — fold=8, Wf=128, single H tile.
    pred1 = jax.random.normal(k1, (2, 4, 16, 16), dtype=jnp.float32)
    tgt1 = jax.random.randint(k2, (2, 16, 16), 0, 4, dtype=jnp.int32)
    loss1 = boundary_loss(pred1, tgt1, theta=1.0)
    jax.block_until_ready(loss1)
    ref1 = _reference_loss(pred1, tgt1, theta=1.0)
    assert jnp.allclose(loss1, ref1, rtol=1e-5, atol=1e-5), (loss1, ref1)

    # Case 2: non-power-of-two W with lane padding, multiple H tiles (halo carry).
    pred2 = jax.random.normal(k3, (1, 3, 64, 40), dtype=jnp.float32)
    tgt2 = jax.random.randint(k4, (1, 64, 40), 0, 3, dtype=jnp.int32)
    loss2 = boundary_loss(pred2, tgt2, theta=0.5, max_tile_rows=8)
    jax.block_until_ready(loss2)
    ref2 = _reference_loss(pred2, tgt2, theta=0.5)
    assert jnp.allclose(loss2, ref2, rtol=1e-5, atol=1e-5), (loss2, ref2)

    print("KERNEL_OK")
</pallas_src>

<mosaic_0001>
module attributes {stable_mosaic.version = 11 : i64} {
  func.func @_boundary_loss_kernel(%arg0: i32, %arg1: i32, %arg2: memref<1x4x8x128xf32, #tpu.memory_space<vmem>>, %arg3: memref<1x8x128xi32, #tpu.memory_space<vmem>>, %arg4: memref<1x8x128xf32, #tpu.memory_space<vmem>>, %arg5: memref<8x128xf32, #tpu.memory_space<vmem>>, %arg6: memref<1x128xf32, #tpu.memory_space<vmem>>) attributes {dimension_semantics = [#tpu.dimension_semantics<parallel>, #tpu.dimension_semantics<arbitrary>], iteration_bounds = array<i64: 2, 1>, scalar_prefetch = 0 : i64, scratch_operands = 2 : i64, tpu.core_type = #tpu.core_type<tc>, window_params = [{transform_indices = @transform_0, window_bounds = array<i64: 1, 4, 8, 128>}, {transform_indices = @transform_1, window_bounds = array<i64: 1, 8, 128>}, {transform_indices = @transform_2, window_bounds = array<i64: 1, 8, 128>}]} {
    %c0 = arith.constant 0 : index
    %c0_0 = arith.constant 0 : index
    %c0_1 = arith.constant 0 : index
    %0 = vector.load %arg3[%c0, %c0_0, %c0_1] : memref<1x8x128xi32, #tpu.memory_space<vmem>>, vector<1x8x128xi32>
    %1 = vector.shape_cast %0 : vector<1x8x128xi32> to vector<8x128xi32>
    %c0_2 = arith.constant 0 : index
    %c0_3 = arith.constant 0 : index
    %c0_4 = arith.constant 0 : index
    %c0_5 = arith.constant 0 : index
    %2 = vector.load %arg2[%c0_2, %c0_3, %c0_4, %c0_5] : memref<1x4x8x128xf32, #tpu.memory_space<vmem>>, vector<1x1x8x128xf32>
    %3 = vector.shape_cast %2 : vector<1x1x8x128xf32> to vector<8x128xf32>
    %c0_6 = arith.constant 0 : index
    %c1 = arith.constant 1 : index
    %c0_7 = arith.constant 0 : index
    %c0_8 = arith.constant 0 : index
    %4 = vector.load %arg2[%c0_6, %c1, %c0_7, %c0_8] : memref<1x4x8x128xf32, #tpu.memory_space<vmem>>, vector<1x1x8x128xf32>
    %5 = vector.shape_cast %4 : vector<1x1x8x128xf32> to vector<8x128xf32>
    %6 = arith.maximumf %3, %5 : vector<8x128xf32>
    %c0_9 = arith.constant 0 : index
    %c2 = arith.constant 2 : index
    %c0_10 = arith.constant 0 : index
    %c0_11 = arith.constant 0 : index
    %7 = vector.load %arg2[%c0_9, %c2, %c0_10, %c0_11] : memref<1x4x8x128xf32, #tpu.memory_space<vmem>>, vector<1x1x8x128xf32>
    %8 = vector.shape_cast %7 : vector<1x1x8x128xf32> to vector<8x128xf32>
    %9 = arith.maximumf %6, %8 : vector<8x128xf32>
    %c0_12 = arith.constant 0 : index
    %c3 = arith.constant 3 : index
    %c0_13 = arith.constant 0 : index
    %c0_14 = arith.constant 0 : index
    %10 = vector.load %arg2[%c0_12, %c3, %c0_13, %c0_14] : memref<1x4x8x128xf32, #tpu.memory_space<vmem>>, vector<1x1x8x128xf32>
    %11 = vector.shape_cast %10 : vector<1x1x8x128xf32> to vector<8x128xf32>
    %12 = arith.maximumf %9, %11 : vector<8x128xf32>
    %cst = arith.constant 0.000000e+00 : f32
    %13 = vector.broadcast %cst : f32 to vector<8x128xf32>
    %cst_15 = arith.constant 0.000000e+00 : f32
    %14 = vector.broadcast %cst_15 : f32 to vector<8x128xf32>
    %c0_16 = arith.constant 0 : index
    %c0_17 = arith.constant 0 : index
    %c0_18 = arith.constant 0 : index
    %c0_19 = arith.constant 0 : index
    %15 = vector.load %arg2[%c0_16, %c0_17, %c0_18, %c0_19] : memref<1x4x8x128xf32, #tpu.memory_space<vmem>>, vector<1x1x8x128xf32>
    %16 = vector.shape_cast %15 : vector<1x1x8x128xf32> to vector<8x128xf32>
    %17 = arith.subf %16, %12 : vector<8x128xf32>
    %18 = math.exp %17 : vector<8x128xf32>
    %19 = arith.addf %13, %18 : vector<8x128xf32>
    %c0_i32 = arith.constant 0 : i32
    %20 = vector.broadcast %c0_i32 : i32 to vector<8x128xi32>
    %21 = arith.cmpi eq, %1, %20 : vector<8x128xi32>
    %22 = arith.select %21, %16, %14 : vector<8x128xi1>, vector<8x128xf32>
    %c0_20 = arith.constant 0 : index
    %c1_21 = arith.constant 1 : index
    %c0_22 = arith.constant 0 : index
    %c0_23 = arith.constant 0 : index
    %23 = vector.load %arg2[%c0_20, %c1_21, %c0_22, %c0_23] : memref<1x4x8x128xf32, #tpu.memory_space<vmem>>, vector<1x1x8x128xf32>
    %24 = vector.shape_cast %23 : vector<1x1x8x128xf32> to vector<8x128xf32>
    %25 = arith.subf %24, %12 : vector<8x128xf32>
    %26 = math.exp %25 : vector<8x128xf32>
    %27 = arith.addf %19, %26 : vector<8x128xf32>
    %c1_i32 = arith.constant 1 : i32
    %28 = vector.broadcast %c1_i32 : i32 to vector<8x128xi32>
    %29 = arith.cmpi eq, %1, %28 : vector<8x128xi32>
    %30 = arith.select %29, %24, %22 : vector<8x128xi1>, vector<8x128xf32>
    %c0_24 = arith.constant 0 : index
    %c2_25 = arith.constant 2 : index
    %c0_26 = arith.constant 0 : index
    %c0_27 = arith.constant 0 : index
    %31 = vector.load %arg2[%c0_24, %c2_25, %c0_26, %c0_27] : memref<1x4x8x128xf32, #tpu.memory_space<vmem>>, vector<1x1x8x128xf32>
    %32 = vector.shape_cast %31 : vector<1x1x8x128xf32> to vector<8x128xf32>
    %33 = arith.subf %32, %12 : vector<8x128xf32>
    %34 = math.exp %33 : vector<8x128xf32>
    %35 = arith.addf %27, %34 : vector<8x128xf32>
    %c2_i32 = arith.constant 2 : i32
    %36 = vector.broadcast %c2_i32 : i32 to vector<8x128xi32>
    %37 = arith.cmpi eq, %1, %36 : vector<8x128xi32>
    %38 = arith.select %37, %32, %30 : vector<8x128xi1>, vector<8x128xf32>
    %c0_28 = arith.constant 0 : index
    %c3_29 = arith.constant 3 : index
    %c0_30 = arith.constant 0 : index
    %c0_31 = arith.constant 0 : index
    %39 = vector.load %arg2[%c0_28, %c3_29, %c0_30, %c0_31] : memref<1x4x8x128xf32, #tpu.memory_space<vmem>>, vector<1x1x8x128xf32>
    %40 = vector.shape_cast %39 : vector<1x1x8x128xf32> to vector<8x128xf32>
    %41 = arith.subf %40, %12 : vector<8x128xf32>
    %42 = math.exp %41 : vector<8x128xf32>
    %43 = arith.addf %35, %42 : vector<8x128xf32>
    %c3_i32 = arith.constant 3 : i32
    %44 = vector.broadcast %c3_i32 : i32 to vector<8x128xi32>
    %45 = arith.cmpi eq, %1, %44 : vector<8x128xi32>
    %46 = arith.select %45, %40, %38 : vector<8x128xi1>, vector<8x128xf32>
    %47 = math.log %43 : vector<8x128xf32>
    %48 = arith.addf %12, %47 : vector<8x128xf32>
    %49 = arith.subf %48, %46 : vector<8x128xf32>
    %c1_i32_32 = arith.constant 1 : i32
    %50 = vector.broadcast %c1_i32_32 : i32 to vector<8x128xi32>
    %51 = arith.cmpi eq, %1, %50 : vector<8x128xi32>
    %52 = arith.extui %51 : vector<8x128xi1> to vector<8x128xi32>
    %53 = arith.sitofp %52 : vector<8x128xi32> to vector<8x128xf32>
    %54 = tpu.iota {dimensions = array<i32: 1>} : vector<1x128xi32>
    %55 = tpu.iota {dimensions = array<i32: 0>} : vector<8x1xi32>
    %c1_i32_33 = arith.constant 1 : i32
    %56 = tpu.dynamic_rotate %53 by %c1_i32_33 dim 1 : vector<8x128xf32>, i32 -> vector<8x128xf32>
    %c15_i32 = arith.constant 15 : i32
    %57 = vector.broadcast %c15_i32 : i32 to vector<1x128xi32>
    %58 = arith.andi %54, %57 : vector<1x128xi32>
    %c0_i32_34 = arith.constant 0 : i32
    %59 = vector.broadcast %c0_i32_34 : i32 to vector<1x128xi32>
    %60 = arith.cmpi eq, %58, %59 : vector<1x128xi32>
    %61 = arith.subf %53, %56 : vector<8x128xf32>
    %62 = math.absf %61 : vector<8x128xf32>
    %cst_35 = arith.constant 0.000000e+00 : f32
    %63 = vector.shape_cast %60 : vector<1x128xi1> to vector<1x128xi1>
    %64 = vector.broadcast %63 : vector<1x128xi1> to vector<8x128xi1>
    %65 = vector.broadcast %cst_35 : f32 to vector<8x128xf32>
    %66 = arith.select %64, %65, %62 : vector<8x128xi1>, vector<8x128xf32>
    %c16_i32 = arith.constant 16 : i32
    %67 = tpu.dynamic_rotate %53 by %c16_i32 dim 1 : vector<8x128xf32>, i32 -> vector<8x128xf32>
    %c0_i32_36 = arith.constant 0 : i32
    %68 = arith.cmpi eq, %arg1, %c0_i32_36 : i32
    %69 = arith.extui %68 : i1 to i32
    %c0_i32_37 = arith.constant 0 : i32
    %70 = arith.cmpi ne, %69, %c0_i32_37 : i32
    scf.if %70 {
      %113 = vector.extract_strided_slice %53 {offsets = [0, 0], sizes = [1, 128], strides = [1, 1]} : vector<8x128xf32> to vector<1x128xf32>
      %c0_57 = arith.constant 0 : index
      %c0_58 = arith.constant 0 : index
      %114 = vector.load %arg6[%c0_57, %c0_58] : memref<1x128xf32, #tpu.memory_space<vmem>>, vector<1x128xf32>
      tpu.vector_store %arg6[%c0_57, %c0_58], %113 {strides = array<i32>} : memref<1x128xf32, #tpu.memory_space<vmem>>, vector<1x128xf32>,
    } else {
    }
    %c0_38 = arith.constant 0 : index
    %c0_39 = arith.constant 0 : index
    %71 = vector.load %arg6[%c0_38, %c0_39] : memref<1x128xf32, #tpu.memory_space<vmem>>, vector<1x128xf32>
    %72 = vector.extract_strided_slice %67 {offsets = [7, 0], sizes = [1, 128], strides = [1, 1]} : vector<8x128xf32> to vector<1x128xf32>
    %c0_40 = arith.constant 0 : index
    %c0_41 = arith.constant 0 : index
    %73 = vector.load %arg6[%c0_40, %c0_41] : memref<1x128xf32, #tpu.memory_space<vmem>>, vector<1x128xf32>
    tpu.vector_store %arg6[%c0_40, %c0_41], %72 {strides = array<i32>} : memref<1x128xf32, #tpu.memory_space<vmem>>, vector<1x128xf32>,
    %c1_i32_42 = arith.constant 1 : i32
    %74 = tpu.dynamic_rotate %67 by %c1_i32_42 dim 0 : vector<8x128xf32>, i32 -> vector<8x128xf32>
    %c0_i32_43 = arith.constant 0 : i32
    %75 = vector.broadcast %c0_i32_43 : i32 to vector<8x1xi32>
    %76 = arith.cmpi eq, %55, %75 : vector<8x1xi32>
    %77 = vector.shape_cast %76 : vector<8x1xi1> to vector<8x1xi1>
    %78 = vector.broadcast %77 : vector<8x1xi1> to vector<8x128xi1>
    %79 = vector.shape_cast %71 : vector<1x128xf32> to vector<1x128xf32>
    %80 = vector.broadcast %79 : vector<1x128xf32> to vector<8x128xf32>
    %81 = arith.select %78, %80, %74 : vector<8x128xi1>, vector<8x128xf32>
    %c16_i32_44 = arith.constant 16 : i32
    %82 = vector.broadcast %c16_i32_44 : i32 to vector<1x128xi32>
    %83 = arith.cmpi slt, %54, %82 : vector<1x128xi32>
    %84 = vector.shape_cast %83 : vector<1x128xi1> to vector<1x128xi1>
    %85 = vector.broadcast %84 : vector<1x128xi1> to vector<8x128xi1>
    %86 = arith.select %85, %81, %67 : vector<8x128xi1>, vector<8x128xf32>
    %87 = arith.subf %53, %86 : vector<8x128xf32>
    %88 = math.absf %87 : vector<8x128xf32>
    %89 = arith.maximumf %88, %66 : vector<8x128xf32>
    %cst_45 = arith.constant 1.000000e+00 : f32
    %90 = vector.broadcast %cst_45 : f32 to vector<8x128xf32>
    %91 = arith.mulf %90, %89 : vector<8x128xf32>
    %cst_46 = arith.constant 1.000000e+00 : f32
    %92 = vector.broadcast %cst_46 : f32 to vector<8x128xf32>
    %93 = arith.addf %92, %91 : vector<8x128xf32>
    %94 = arith.mulf %93, %49 : vector<8x128xf32>
    %c8_i32 = arith.constant 8 : i32
    %95 = arith.muli %arg1, %c8_i32 : i32
    %96 = vector.broadcast %95 : i32 to vector<8x1xi32>
    %97 = arith.addi %96, %55 : vector<8x1xi32>
    %c2_i32_47 = arith.constant 2 : i32
    %98 = vector.broadcast %c2_i32_47 : i32 to vector<8x1xi32>
    %99 = arith.cmpi slt, %97, %98 : vector<8x1xi32>
    %cst_48 = arith.constant 0.000000e+00 : f32
    %100 = vector.shape_cast %99 : vector<8x1xi1> to vector<8x1xi1>
    %101 = vector.broadcast %100 : vector<8x1xi1> to vector<8x128xi1>
    %102 = vector.broadcast %cst_48 : f32 to vector<8x128xf32>
    %103 = arith.select %101, %94, %102 : vector<8x128xi1>, vector<8x128xf32>
    %c0_i32_49 = arith.constant 0 : i32
    %104 = arith.cmpi eq, %arg1, %c0_i32_49 : i32
    %105 = arith.extui %104 : i1 to i32
    %c0_i32_50 = arith.constant 0 : i32
    %106 = arith.cmpi ne, %105, %c0_i32_50 : i32
    scf.if %106 {
      %cst_57 = arith.constant 0.000000e+00 : f32
      %113 = vector.broadcast %cst_57 : f32 to vector<8x128xf32>
      %c0_58 = arith.constant 0 : index
      %c0_59 = arith.constant 0 : index
      %114 = vector.load %arg5[%c0_58, %c0_59] : memref<8x128xf32, #tpu.memory_space<vmem>>, vector<8x128xf32>
      tpu.vector_store %arg5[%c0_58, %c0_59], %113 {strides = array<i32>} : memref<8x128xf32, #tpu.memory_space<vmem>>, vector<8x128xf32>,
    } else {
    }
    %c0_51 = arith.constant 0 : index
    %c0_52 = arith.constant 0 : index
    %107 = vector.load %arg5[%c0_51, %c0_52] : memref<8x128xf32, #tpu.memory_space<vmem>>, vector<8x128xf32>
    %108 = arith.addf %107, %103 : vector<8x128xf32>
    %c0_53 = arith.constant 0 : index
    %c0_54 = arith.constant 0 : index
    %109 = vector.load %arg5[%c0_53, %c0_54] : memref<8x128xf32, #tpu.memory_space<vmem>>, vector<8x128xf32>
    tpu.vector_store %arg5[%c0_53, %c0_54], %108 {strides = array<i32>} : memref<8x128xf32, #tpu.memory_space<vmem>>, vector<8x128xf32>,
    %c0_i32_55 = arith.constant 0 : i32
    %110 = arith.cmpi eq, %arg1, %c0_i32_55 : i32
    %111 = arith.extui %110 : i1 to i32
    %c0_i32_56 = arith.constant 0 : i32
    %112 = arith.cmpi ne, %111, %c0_i32_56 : i32
    scf.if %112 {
      %c0_57 = arith.constant 0 : index
      %c0_58 = arith.constant 0 : index
      %113 = vector.load %arg5[%c0_57, %c0_58] : memref<8x128xf32, #tpu.memory_space<vmem>>, vector<8x128xf32>
      %114 = vector.shape_cast %113 : vector<8x128xf32> to vector<1x8x128xf32>
      %cst_59 = arith.constant dense<0.000000e+00> : vector<1xf32>
      %115 = vector.multi_reduction <add>, %114, %cst_59 [1, 2] : vector<1x8x128xf32> to vector<1xf32>
      %116 = vector.shape_cast %115 : vector<1xf32> to vector<1x1x1xf32>
      %117 = vector.extract %116[0, 0, 0] : f32 from vector<1x1x1xf32>
      %118 = vector.broadcast %117 : f32 to vector<1x8x128xf32>
      %c0_60 = arith.constant 0 : index
      %c0_61 = arith.constant 0 : index
      %c0_62 = arith.constant 0 : index
      %119 = vector.load %arg4[%c0_60, %c0_61, %c0_62] : memref<1x8x128xf32, #tpu.memory_space<vmem>>, vector<1x8x128xf32>
      tpu.vector_store %arg4[%c0_60, %c0_61, %c0_62], %118 {strides = array<i32>} : memref<1x8x128xf32, #tpu.memory_space<vmem>>, vector<1x8x128xf32>,
    } else {
    }
    return
  }
  func.func @transform_0(%arg0: i32, %arg1: i32) -> (i32, i32, i32, i32) {
    %c0_i32 = arith.constant 0 : i32
    %c0_i32_0 = arith.constant 0 : i32
    %c0_i32_1 = arith.constant 0 : i32
    return %arg0, %c0_i32, %arg1, %c0_i32_0 : i32, i32, i32, i32
  }
  func.func @transform_1(%arg0: i32, %arg1: i32) -> (i32, i32, i32) {
    %c0_i32 = arith.constant 0 : i32
    %c0_i32_0 = arith.constant 0 : i32
    return %arg0, %arg1, %c0_i32 : i32, i32, i32
  }
  func.func @transform_2(%arg0: i32, %arg1: i32) -> (i32, i32, i32) {
    %c0_i32 = arith.constant 0 : i32
    %c0_i32_0 = arith.constant 0 : i32
    %c0_i32_1 = arith.constant 0 : i32
    return %arg0, %c0_i32, %c0_i32_0 : i32, i32, i32
  }
}

</mosaic_0001>

<bundles_post_ra>
// kernel: tpu_custom_call.1
= control target key start
LH: loop header
LB: loop body
LE: loop exit
PB: predicated region body
PF: predicated region fallthrough
CT: control target
= control target key end

     0   :  { %7 = vsyncpa [#allocation5], 0  ;;  %s944_s0 = inlined_call_operand.hbm [shape: f32[2,4,8,128], index: 0, kind: input, shape index: {}]   ;;  %s945_s1 = inlined_call_operand.hbm [shape: s32[2,8,128], index: 1, kind: input, shape index: {}]   ;;  %s946_s2 = inlined_call_operand.hbm [shape: f32[2,8,128], index: 2, kind: output, shape index: {}]  }
   0x1   :  { %9 = vsyncpa [#allocation5 + $0x1], 0 }
   0x2   :  { %10 = vsyncpa [#allocation8], 0 }
   0x3   :  { %12 = vsyncpa [#allocation8 + $0x1], 0 }
   0x4   :  { %13 = vsyncpa [#allocation6], 0 }
   0x5   :  { %15 = vsyncpa [#allocation6 + $0x1], 0  ;;  %s725_s9 = smov 0   ;;  %s727_s10 = smov 0  }
   0x6   :  { %s729_s11 = smov 0   ;;  %s731_s12 = smov 0  }
   0x7   :  { %s733_s13 = smov 0   ;;  %s735_s14 = smov 0  }
   0x8 LB: > { %s447_s15 = sadd.s32 4294967295, %s700_s14   ;;  %s448_s16 = sadd.s32 4294967294, %s700_s14   ;;  %s700_s14 = sphi %s735_s14, %s21_s14   ;;  %s696_s13 = sphi %s733_s13, %s965_s13   ;;  %s692_s12 = sphi %s731_s12, %s964_s12   ;;  %s688_s11 = sphi %s729_s11, %s963_s11   ;;  %s684_s10 = sphi %s727_s10, %s962_s10   ;;  %s680_s9 = sphi %s725_s9, %s961_s9  }
   0x9   : > { %s33_s17 = sadd.s32 1, %s696_s13  ;;  %s42_s18 = sadd.s32 1, %s688_s11 }
   0xa   : > { %p35_p0 = scmp.ge.s32.totalorder %s33_s17, 2  ;;  %p49_p1 = scmp.ne.s32.totalorder %s688_s11, %s684_s10 }
   0xb   : > { %p50_p2 = scmp.eq.s32.totalorder %s700_s14, 0  ;;  %p55_p3 = scmp.ne.s32.totalorder %s684_s10, %s680_s9 }
   0xc   : > { %s967_s17 = smov (%p35_p0, %s33_s17), 0  ;;  %p56_p5 = scmp.eq.s32.totalorder %s447_s15, 0 }
   0xd   : > { %p766_p4 = por %p50_p2, %p49_p1  ;;  %s37_s20 = ssub.s32 %s696_s13, %s967_s17 }
   0xe   : > { %p107_p6 = scmp.eq.s32.totalorder %s447_s15, 1  ;;  %p40_p7 = scmp.eq.s32.totalorder %s37_s20, 0 }
   0xf   : > { %p772_p8 = por %p56_p5, %p55_p3  ;;  %p113_p10 = scmp.eq.s32.totalorder %s448_s16, 1 }
  0x10   : > { %p776_p9 = por %p107_p6, %p49_p1  ;;  %p489_p13 = scmp.lt.s32.totalorder %s700_s14, 2 }
  0x11   : > { %s950_s21 = scalar_select %p772_p8, 1, 0 }
  0x12   : > { %s951_s22 = scalar_select %p776_p9, 1, 0 }
  0x13   : > { %s781_s23 = scalar_select %p40_p7, %s688_s11, %s42_s18  }
  0x14   : > { %p783_p11 = por %p113_p10, %p55_p3  ;;  %s790_s25 = sand.u32 1, %s688_s11  }
  0x15   : > { %s451_s26 = sshll.u32 %s790_s25, 5  ;;  %s469_s27 = sshll.u32 %s696_s13, 9 }
  0x16   : > { %s952_s24 = scalar_select %p783_p11, 1, 0 }
  0x17   : > { %s797_s30 = scalar_lea.hbm %s944_s0, %s469_s27  ;;  %s137_s3 = scalar_lea.vmem [#allocation4], %s451_s26 }
  0x18   : > { %s145_s4 = sshll.u32 %s137_s3, 4  ;;  %p803_p0 = pnand %p489_p13, %p766_p4  ;;  %s799_s4 = int_to_ptr.vmem [resolvable:$true] %s145_s4 }
  0x19   : > { %s134_s6 = scalar_lea.sflag [#allocation5], %s790_s25  ;;  %s554_s7 = scalar_lea.hbm %s797_s30, 512 }
  0x1a   : > { %p555_p2 = scmp.ne.s32.totalorder %s797_s30, %s554_s7  ;;  %p556_p3 = pneg %p803_p0 }
  0x1b   : > { %s559_s16 = scalar_lea.hbm %s944_s0, 1024  ;;  %p560_p4 = scmp.lt.u32.totalorder %s797_s30, %s944_s0 }
  0x1c   : > { %p557_p5 = pnand %p556_p3, %p555_p2  ;;  %p561_p7 = scmp.lt.u32.totalorder %s559_s16, %s554_s7 }
  0x1d   : > { %p563_p13 = scmp.lt.u32.totalorder %s554_s7, %s797_s30 }
  0x1e   : > { %p558_p6 = pneg %p557_p5  ;;  %p562_p10 = por %p561_p7, %p560_p4 }
  0x20   : > { %p564_p12 = por %p563_p13, %p562_p10 }
  0x22   : > { %p565_p1 = pnand %p564_p12, %p558_p6 }
  0x24   : > { %568 = shalt.err (!%p565_p1)
}
  0x25   : > { %s569_s20 = scalar_lea.vmem %s799_s4, 512  ;;  %s702_s26 = smov [#allocation4]  }
  0x26   : > { %p570_p2 = scmp.ne.s32.totalorder %s799_s4, %s569_s20  ;;  %s574_s27 = sshll.u32 %s702_s26, 4  ;;  %s575_s27 = int_to_ptr.vmem [resolvable:$false] %s574_s27 }
  0x27   : > { %s576_s28 = scalar_lea.vmem %s575_s27, 1024  ;;  %p577_p9 = scmp.lt.s32.totalorder %s799_s4, %s575_s27 }
  0x28   : > { %p572_p5 = pnand %p570_p2, %p556_p3  ;;  %p578_p4 = scmp.lt.s32.totalorder %s576_s28, %s569_s20 }
  0x2a   : > { %p573_p11 = pneg %p572_p5  ;;  %p579_p7 = por %p578_p4, %p577_p9 }
  0x2c   : > { %p580_p10 = pnand %p579_p7, %p573_p11 }
  0x2e   : > { %583 = shalt.err (!%p580_p10)
}
  0x2f   : > { %s703_s29 = smov 128   ;;  %s704_s3 = smov 8  }
  0x30   : > { %481 = dma.hbm_to_vmem [thread:$0]  (!%p803_p0), %s797_s30, 512, %s799_s4, %s134_s6, %s703_s29, %s703_s29, %s704_s3  }
  0x31   : > { %p172_p12 = scmp.lt.s32.totalorder %s700_s14, 3  ;;  %s454_s7 = sshll.u32 %s790_s25, 3 }
  0x32   : > { %s455_s8 = sshll.u32 %s696_s13, 7  ;;  %p954_p9 = scmp.ge.s32.totalorder %s700_s14, 1 }
  0x33   : > { %s848_s19 = scalar_lea.hbm %s945_s1, %s455_s8  ;;  %s159_s20 = scalar_lea.vmem [#allocation7], %s454_s7 }
  0x34   : > { %p841_p11 = pnand %p954_p9, %p172_p12  ;;  %s167_s26 = sshll.u32 %s159_s20, 4  ;;  %s168_s26 = int_to_ptr.vmem [resolvable:$true] %s167_s26 }
  0x35   : > { %s156_s30 = scalar_lea.sflag [#allocation8], %s790_s25  ;;  %s584_s4 = scalar_lea.hbm %s848_s19, 128 }
  0x36   : > { %s955_s15 = scalar_select %p841_p11, 1, 0 }
  0x37   : > { %p585_p1 = scmp.ne.s32.totalorder %s848_s19, %s584_s4  ;;  %s589_s28 = scalar_lea.hbm %s945_s1, 256 }
  0x38   : > { %p590_p2 = scmp.lt.u32.totalorder %s848_s19, %s945_s1  ;;  %p591_p5 = scmp.lt.u32.totalorder %s589_s28, %s584_s4 }
  0x39   : > { %p587_p6 = pnand %p585_p1, %p556_p3  ;;  %p593_p7 = scmp.lt.u32.totalorder %s584_s4, %s848_s19 }
  0x3a   : > { %p592_p4 = por %p591_p5, %p590_p2 }
  0x3b   : > { %p588_p13 = pneg %p587_p6 }
  0x3c   : > { %p594_p10 = por %p593_p7, %p592_p4 }
  0x3e   : > { %p595_p12 = pnand %p594_p10, %p588_p13 }
  0x40   : > { %598 = shalt.err (!%p595_p12)
}
  0x41   : > { %s599_s25 = scalar_lea.vmem %s168_s26, 128  ;;  %s705_s7 = smov [#allocation7]  }
  0x42   : > { %p600_p9 = scmp.ne.s32.totalorder %s168_s26, %s599_s25  ;;  %s604_s8 = sshll.u32 %s705_s7, 4  ;;  %s605_s8 = int_to_ptr.vmem [resolvable:$false] %s604_s8 }
  0x43   : > { %s606_s16 = scalar_lea.vmem %s605_s8, 256  ;;  %p607_p8 = scmp.lt.s32.totalorder %s168_s26, %s605_s8 }
  0x44   : > { %p602_p1 = pnand %p600_p9, %p556_p3  ;;  %p608_p11 = scmp.lt.s32.totalorder %s606_s16, %s599_s25 }
  0x46   : > { %p603_p6 = pneg %p602_p1  ;;  %p609_p2 = por %p608_p11, %p607_p8 }
  0x48   : > { %p610_p5 = pnand %p609_p2, %p603_p6 }
  0x4a   : > { %613 = shalt.err (!%p610_p5)
}
  0x4b   : > { %484 = dma.hbm_to_vmem [thread:$0]  (!%p803_p0), %s848_s19, 128, %s168_s26, %s156_s30  }
  0x4c   : > { %p956_p13 = scmp.ne.s32.totalorder %s955_s15, 0 }
  0x4d   : > { %s873_s18 = sand.u32 (!%p956_p13), 1, %s684_s10   ;;  %p957_p3 = scmp.ne.s32.totalorder (!%p956_p13), %s950_s21, 0 }
  0x4e   : > { %176 = sbr.rel (%p956_p13) target bundleno = 442 (0x1ba), region = 28  ;;  %s457_s20 = sshll.u32 (!%p956_p13), %s873_s18, 5 }
  0x4f   : > { %s179_s4 = scalar_lea.sflag (!%p956_p13), [#allocation5], %s873_s18  ;;  %s182_s6 = scalar_lea.vmem (!%p956_p13), [#allocation4], %s457_s20 }
  0x55   : > { %667 = dma.done.wait (%p957_p3), %s179_s4, 512  }
  0x56   : > { %669 = vsyncadd (%p957_p3), %s179_s4, 4294966784  ;;  %s458_s5 = sshll.u32 %s873_s18, 3  ;;  %s188_s15 = scalar_lea.sflag [#allocation8], %s873_s18 }
  0x57   : > { %s191_s19 = scalar_lea.vmem [#allocation7], %s458_s5 }
  0x58   : > { %671 = dma.done.wait (%p957_p3), %s188_s15, 128  }
  0x59   : > { %673 = vsyncadd (%p957_p3), %s188_s15, 4294967168  ;;  %v217_v0 = vld [vmem:[%s191_s19] sm:$0xff]  ;;  %v706_v3 = vmov 0.0   ;;  %s707_s26 = smov 16   ;;  %v461_v7 = vld [vmem:[%s182_s6 + $0x10] sm:$0xff]  ;;  %s708_s21 = smov 1   ;;  %v258_v29 = vlaneseq }
  0x5a   : > { %v218_v1 = vld [vmem:[%s182_s6] sm:$0xff]  ;;  %vm238_vm0 = vcmp.eq.s32.totalorder %v217_v0, 1  ;;  %vm232_vm1 = vcmp.eq.s32.totalorder %v217_v0, 0  ;;  %vm244_vm2 = vcmp.eq.s32.totalorder %v217_v0, 2  ;;  %v460_v2 = vld [vmem:[%s182_s6 + $0x8] sm:$0xff]  ;;  %vm250_vm3 = vcmp.eq.s32.totalorder %v217_v0, 3 }
  0x5b   : > { %v463_v4 = vsel %vm238_vm0, 1.0, %v706_v3  ;;  %v233_v5 = vsel %vm232_vm1, %v218_v1, 0.0  ;;  %v462_v8 = vld [vmem:[%s182_s6 + $0x18] sm:$0xff]  ;;  %v221_v11 = vmax.f32 %v218_v1, %v460_v2  ;;  %v261_v30 = vshrl.u32 %v258_v29, 7  ;;  %s216_s30 = scalar_lea.vmem [#allocation9], %s458_s5  ;;  %s466_s28 = sshll.u32 %s692_s12, 7 }
  0x5c   : > { %271 = vrot.lane.b32.xlu0 %v463_v4, %s707_s26  ;;  %v239_v6 = vsel %vm238_vm0, %v460_v2, %v233_v5  ;;  %277 = vst [vmem:[#allocation3] sm:$0x1] %v463_v4  ;;  %v259_v31 = vand.u32 127, %v258_v29  ;;  %s343_s27 = sshll.u32 %s216_s30, 4  ;;  %s897_s7 = scalar_lea.hbm %s946_s2, %s466_s28  ;;  %s892_s27 = int_to_ptr.vmem [resolvable:$true] %s343_s27 }
  0x5d   : > { %v245_v9 = vsel %vm244_vm2, %v461_v7, %v239_v6  ;;  %v224_v12 = vmax.f32 %v221_v11, %v461_v7  ;;  %vm281_vm4 = vcmp.eq.s32.totalorder %v261_v30, 0  ;;  %vm303_vm7 = vcmp.lt.s32.totalorder %v261_v30, 2  ;;  %s330_s8 = scalar_lea.sflag [#allocation6], %s873_s18  ;;  %s614_s16 = scalar_lea.vmem %s892_s27, 128 }
  0x5e   : > { %v251_v10 = vsel %vm250_vm3, %v462_v8, %v245_v9  ;;  %vm291_vm5 = vcmp.lt.s32.totalorder %v259_v31, 16  ;;  %v264_v36 = vand.u32 15, %v259_v31  ;;  %p615_p8 = scmp.ne.s32.totalorder %s892_s27, %s614_s16  ;;  %p958_p0 = scmp.ne.s32.totalorder %s951_s22, 0 }
  0x5f   : > { %v227_v13 = vmax.f32 %v224_v12, %v462_v8  ;;  %s709_s12 = smov [#allocation9]  }
  0x60   : > { %262 = vrot.lane.b32.xlu0 %v463_v4, %s708_s21  ;;  %vm265_vm6 = vcmp.eq.s32.totalorder %v264_v36, 0  ;;  %p616_p11 = pnand %p615_p8, %p958_p0  ;;  %s618_s20 = sshll.u32 %s709_s12, 4  ;;  %s619_s20 = int_to_ptr.vmem [resolvable:$false] %s618_s20 }
  0x61   : > { %v228_v14 = vsub.f32 %v218_v1, %v227_v13  ;;  %v234_v15 = vsub.f32 %v460_v2, %v227_v13  ;;  %v240_v18 = vsub.f32 %v461_v7, %v227_v13  ;;  %v246_v20 = vsub.f32 %v462_v8, %v227_v13  ;;  %s620_s4 = scalar_lea.vmem %s619_s20, 256  ;;  %p621_p7 = scmp.lt.s32.totalorder %s892_s27, %s619_s20 }
  0x62   : > { %p617_p4 = pneg %p616_p11  ;;  %p622_p10 = scmp.lt.s32.totalorder %s620_s4, %s614_s16 }
  0x63   : > { %v229_v16 = vmul.f32 1.442695, %v228_v14  ;;  %v235_v17 = vmul.f32 1.442695, %v234_v15  ;;  %v241_v19 = vmul.f32 1.442695, %v240_v18 }
  0x64   : > { %v247_v21 = vmul.f32 1.442695, %v246_v20  ;;  %v464_v32 = vld [vmem:[#allocation3] ss:$0 sm:$0xff]  ;;  %p623_p12 = por %p622_p10, %p621_p7 }
  0x65   : > { %544 = vpow2.f32 %v229_v16 }
  0x66   : > { %546 = vpow2.f32 %v235_v17  ;;  %p624_p9 = pnand %p623_p12, %p617_p4 }
  0x67   : > { %548 = vpow2.f32 %v241_v19 }
  0x68   : > { %550 = vpow2.f32 %v247_v21 }
  0x6f   : > { %v545_v22 = vpop.eup %544 }
  0x70   : > { %v547_v23 = vpop.eup %546 }
  0x71   : > { %v237_v24 = vadd.f32 %v547_v23, %v545_v22  ;;  %v549_v25 = vpop.eup %548 }
  0x72   : > { %v551_v27 = vpop.eup %550 }
  0x73   : > { %v243_v26 = vadd.f32 %v549_v25, %v237_v24 }
  0x75   : > { %v249_v28 = vadd.f32 %v551_v27, %v243_v26 }
  0x77   : > { %552 = vlog2.f32 %v249_v28 }
  0x81   : > { %v553_v33 = vpop.eup %552 }
  0x82   : > { %v253_v37 = vmul.f32 0.6931472, %v553_v33 }
  0x84   : > { %v254_v43 = vadd.f32 %v253_v37, %v227_v13 }
  0x86   : > { %v255_v47 = vsub.f32 %v254_v43, %v251_v10 }
  0xce   : > { %v272_v34 = vpop.permute.xlu0 %271 }
  0xcf   : > { %279 = vst [vmem:[#allocation3 - $0x7] sm:$0x80] %v272_v34  ;;  %v280_v35 = vrot.slane %v272_v34, 7 }
  0xd1   : > { %v290_v38 = vsel %vm281_vm4, %v464_v32, %v280_v35 }
  0xd2   : > { %v263_v39 = vpop.permute.xlu0 %262  ;;  %v294_v40 = vsel %vm291_vm5, %v290_v38, %v272_v34 }
  0xd3   : > { %v266_v41 = vsub.f32 %v463_v4, %v263_v39  ;;  %v295_v42 = vsub.f32 %v463_v4, %v294_v40 }
  0xd5   : > { %v267_v44 = vand.u32 2147483647, %v266_v41  ;;  %v296_v45 = vand.u32 2147483647, %v295_v42 }
  0xd7   : > { %v270_v46 = vsel %vm265_vm6, 0.0, %v267_v44 }
  0xd8   : > { %v297_v48 = vmax.f32 %v296_v45, %v270_v46 }
  0xda   : > { %v298_v49 = vadd.f32 1.0, %v297_v48 }
  0xdc   : > { %v299_v50 = vmul.f32 %v298_v49, %v255_v47 }
  0xde   : > { %v306_v51 = vsel %vm303_vm7, %v299_v50, 0.0 }
  0xdf   : > { %318 = vadd.xlane.f32.xlu1 %v306_v51 }
 0x16c   : > { %v319_v52 = vpop.xlane.xlu1 %318 }
 0x16d   : > { %v320_v53 = vrot.slane %v319_v52, 4 }
 0x16f   : > { %v321_v54 = vadd.f32 %v320_v53, %v319_v52 }
 0x171   : > { %v322_v55 = vrot.slane %v321_v54, 2 }
 0x173   : > { %v323_v56 = vadd.f32 %v322_v55, %v321_v54 }
 0x175   : > { %v324_v57 = vrot.slane %v323_v56, 1 }
 0x177   : > { %v325_v58 = vadd.f32 %v324_v57, %v323_v56 }
 0x179   : > { %470 = vpush %v325_v58 }
 0x1aa   : > { %s471_s29 = spop %470 }
 0x1ab   : > { %v327_v59 = vstv %s471_s29 }
 0x1ac   : > { %328 = vst [vmem:[%s216_s30] sm:$0xff] %v327_v59 }
 0x1ad   : > { %627 = shalt.err (!%p624_p9)
}
 0x1ae   : > { %s628_s18 = scalar_lea.hbm %s897_s7, 128  ;;  %s632_s15 = scalar_lea.hbm %s946_s2, 256 }
 0x1af   : > { %p629_p1 = scmp.ne.s32.totalorder %s897_s7, %s628_s18  ;;  %p633_p5 = scmp.lt.u32.totalorder %s897_s7, %s946_s2 }
 0x1b0   : > { %p634_p13 = scmp.lt.u32.totalorder %s632_s15, %s628_s18  ;;  %p636_p8 = scmp.lt.u32.totalorder %s628_s18, %s897_s7 }
 0x1b1   : > { %p630_p6 = pnand %p629_p1, %p958_p0 }
 0x1b2   : > { %p635_p3 = por %p634_p13, %p633_p5 }
 0x1b3   : > { %p631_p2 = pneg %p630_p6 }
 0x1b4   : > { %p637_p11 = por %p636_p8, %p635_p3 }
 0x1b6   : > { %p638_p4 = pnand %p637_p11, %p631_p2 }
 0x1b8   : > { %641 = shalt.err (!%p638_p4)
}
 0x1b9   : > { %476 = dma.vmem_to_hbm [thread:$0]  (%p958_p0), %s892_s27, 128, %s897_s7, %s330_s8  }
 0x1ba PF: > { %s355_s21 = sand.u32 1, %s680_s9   ;;  %p959_p7 = scmp.ne.s32.totalorder %s952_s24, 0 }
 0x1bb   : > { %p960_p10 = scmp.ge.s32.totalorder %s700_s14, 2  ;;  %s356_s30 = scalar_lea.sflag [#allocation6], %s355_s21 }
 0x1bd   : > { %p486_p12 = pnand %p960_p10, %p959_p7 }
 0x1bf   : > { %675 = dma.done.wait (!%p486_p12), %s356_s30, 128  }
 0x1c0   : > { %677 = vsyncadd (!%p486_p12), %s356_s30, 4294967168  ;;  %s21_s14 = sadd.s32 1, %s700_s14   ;;  %s961_s9 = smov %s684_s10 }
 0x1c1   : > { %p18_p9 = scmp.ge.s32.totalorder %s21_s14, 4   ;;  %s962_s10 = smov %s688_s11 }
 0x1c2   : > { %s963_s11 = smov %s781_s23  ;;  %s964_s12 = smov %s696_s13 }
 0x1c3   : > { %s965_s13 = smov %s967_s17  ;;  %20 = sbr.rel (!%p18_p9) target bundleno = 8 (0x8), region = 101 }
 0x1ca   :  { %361 = vsyncpa [#allocation5], 1 }
 0x1cb   :  { %363 = vsyncpa [#allocation5 + $0x1], 1 }
 0x1cc   :  { %364 = vsyncpa [#allocation8], 1 }
 0x1cd   :  { %366 = vsyncpa [#allocation8 + $0x1], 1 }
 0x1ce   :  { %367 = vsyncpa [#allocation6], 1 }
 0x1cf   :  { %369 = vsyncpa [#allocation6 + $0x1], 1 }

</bundles_post_ra>
